<compile_context>
chip_gen: v6e
topology: v6e:2x2x1
jax: 0.10.0
libtpu: 0.0.40
codegen_flags: <defaults>
</compile_context>

<pallas_src>
import functools

import jax
import jax.numpy as jnp
from jax.experimental import pallas as pl
from jax.experimental.pallas import tpu as pltpu


def _round_up(a, b):
    return (a + b - 1) // b * b


def _ce_kernel(x_ref, lbl_ref, out_ref, acc_ref, *,
               tile_rows, tiles_per_split, n_total):
    # x_ref:   (3, tile_rows, 128) logits (f32 or bf16)
    # lbl_ref: (tile_rows, 128)    int32 labels
    # out_ref: (1, 1, 1)           f32 partial loss for this split
    # acc_ref: (tile_rows, 128)    f32 lane/sublane-dense accumulator
    p = pl.program_id(0)          # parallel split (TensorCore shard on v7x)
    i = pl.program_id(1)          # reduction step within the split

    @pl.when(i == 0)
    def _init():
        acc_ref[...] = jnp.zeros_like(acc_ref)

    # Per-class (tile_rows, 128) slabs read straight from the ref, f32 math.
    x0 = x_ref[0].astype(jnp.float32)
    x1 = x_ref[1].astype(jnp.float32)
    x2 = x_ref[2].astype(jnp.float32)
    lbl = lbl_ref[...]

    # 3-way logsumexp with only 2 exps: exp(max - max) == 1.
    hi01 = jnp.maximum(x0, x1)
    lo01 = jnp.minimum(x0, x1)
    m = jnp.maximum(hi01, x2)          # max of the three
    a = lo01                           # one non-max value
    b = jnp.minimum(hi01, x2)          # the other non-max value
    s = jnp.exp(a - m) + jnp.exp(b - m)
    lse = m + jnp.log(1.0 + s)         # s in (0, 2], plain log is safe here

    # True-class logit via selects (replaces one_hot * softmax + reduce).
    x_true = jnp.where(lbl == 0, x0, jnp.where(lbl == 1, x1, x2))
    per_sample = lse - x_true          # per-sample NLL

    # Mask samples beyond the real N (zero-padded samples would add log(3)).
    row = jax.lax.broadcasted_iota(jnp.int32, per_sample.shape, 0)
    lane = jax.lax.broadcasted_iota(jnp.int32, per_sample.shape, 1)
    block_row0 = (p * tiles_per_split + i) * tile_rows
    idx = (block_row0 + row) * 128 + lane
    acc_ref[...] += jnp.where(idx < n_total, per_sample, 0.0)

    @pl.when(i == pl.num_programs(1) - 1)
    def _finalize():
        out_ref[...] = jnp.reshape(jnp.sum(acc_ref[...]), (1, 1, 1))


def cross_entropy_loss(fc_out, label, *, tile_rows=1024, n_splits=2):
    """fc_out: (N, 3) float (f32 or bf16); label: (N,) int — scalar f32 loss."""
    n, c = fc_out.shape
    assert c == 3, "module hard-codes 3 classes"

    rows = pl.cdiv(n, 128)                       # 128 samples per row (lanes)
    n_splits = max(1, min(n_splits, rows))       # don't over-split tiny inputs
    rows_per_split = pl.cdiv(rows, n_splits)
    tile_rows = max(8, _round_up(min(tile_rows, rows_per_split), 8))
    tiles_per_split = pl.cdiv(rows_per_split, tile_rows)
    rows_pad = n_splits * tiles_per_split * tile_rows
    n_pad = rows_pad * 128

    # Lane-dense presentation: classes leading, samples on (rows, 128 lanes).
    x = jnp.transpose(fc_out)                                    # (3, N)
    x = jnp.pad(x, ((0, 0), (0, n_pad - n))).reshape(c, rows_pad, 128)
    lbl = jnp.pad(label.astype(jnp.int32), (0, n_pad - n)).reshape(rows_pad, 128)

    kernel = functools.partial(
        _ce_kernel, tile_rows=tile_rows,
        tiles_per_split=tiles_per_split, n_total=n)

    partial = pl.pallas_call(
        kernel,
        out_shape=jax.ShapeDtypeStruct((n_splits, 1, 1), jnp.float32),
        grid_spec=pltpu.PrefetchScalarGridSpec(
            num_scalar_prefetch=0,
            grid=(n_splits, tiles_per_split),
            in_specs=[
                pl.BlockSpec((c, tile_rows, 128),
                             lambda p, i: (0, p * tiles_per_split + i, 0)),
                pl.BlockSpec((tile_rows, 128),
                             lambda p, i: (p * tiles_per_split + i, 0)),
            ],
            out_specs=pl.BlockSpec((1, 1, 1), lambda p, i: (p, 0, 0)),
            scratch_shapes=[pltpu.VMEM((tile_rows, 128), jnp.float32)],
        ),
        compiler_params=pltpu.CompilerParams(
            dimension_semantics=("parallel", "arbitrary"),
            vmem_limit_bytes=32 * 1024 * 1024),
    )(x, lbl)

    return jnp.sum(partial) / jnp.float32(n)


def _reference(fc_out, label):
    probs = jax.nn.softmax(fc_out.astype(jnp.float32), axis=1)
    p_true = jnp.take_along_axis(probs, label[:, None], axis=1)[:, 0]
    return -jnp.sum(jnp.log(p_true)) / fc_out.shape[0]


if __name__ == "__main__":
    key = jax.random.PRNGKey(0)
    k1, k2, k3, k4 = jax.random.split(key, 4)

    # Small case matching the module (3 classes); N not a multiple of 128.
    N, C = 8, 3
    fc_out = jax.random.normal(k1, (N, C), dtype=jnp.float32)
    label = jax.random.randint(k2, (N,), 0, C, dtype=jnp.int32)
    loss = cross_entropy_loss(fc_out, label)
    jax.block_until_ready(loss)
    ref = _reference(fc_out, label)
    assert jnp.allclose(loss, ref, rtol=1e-5, atol=1e-5), (loss, ref)

    # Multi-tile, multi-split path (init/accumulate/finalize per split + mask).
    N2 = 3000
    fc2 = jax.random.normal(k3, (N2, C), dtype=jnp.float32)
    lbl2 = jax.random.randint(k4, (N2,), 0, C, dtype=jnp.int32)
    loss2 = cross_entropy_loss(fc2, lbl2, tile_rows=8, n_splits=2)
    jax.block_until_ready(loss2)
    ref2 = _reference(fc2, lbl2)
    assert jnp.allclose(loss2, ref2, rtol=1e-5, atol=1e-5), (loss2, ref2)

    # bf16 logits path (kernel upcasts in-VMEM; both sides see the same values).
    fc2_bf16 = fc2.astype(jnp.bfloat16)
    loss3 = cross_entropy_loss(fc2_bf16, lbl2, tile_rows=8, n_splits=2)
    jax.block_until_ready(loss3)
    ref3 = _reference(fc2_bf16, lbl2)
    assert jnp.allclose(loss3, ref3, rtol=1e-4, atol=1e-4), (loss3, ref3)

    print("KERNEL_OK")
</pallas_src>

<mosaic_0001>
module attributes {stable_mosaic.version = 11 : i64} {
  func.func @_ce_kernel(%arg0: i32, %arg1: i32, %arg2: memref<3x8x128xf32, #tpu.memory_space<vmem>>, %arg3: memref<8x128xi32, #tpu.memory_space<vmem>>, %arg4: memref<1x1x1xf32, #tpu.memory_space<vmem>>, %arg5: memref<8x128xf32, #tpu.memory_space<vmem>>) attributes {dimension_semantics = [#tpu.dimension_semantics<parallel>, #tpu.dimension_semantics<arbitrary>], iteration_bounds = array<i64: 1, 1>, scalar_prefetch = 0 : i64, scratch_operands = 1 : i64, tpu.core_type = #tpu.core_type<tc>, window_params = [{transform_indices = @transform_0, window_bounds = array<i64: 3, 8, 128>}, {transform_indices = @transform_1, window_bounds = array<i64: 8, 128>}, {transform_indices = @transform_2, window_bounds = array<i64: 1, 1, 1>}]} {
    %c0_i32 = arith.constant 0 : i32
    %0 = arith.cmpi eq, %arg1, %c0_i32 : i32
    %1 = arith.extui %0 : i1 to i32
    %c0_i32_0 = arith.constant 0 : i32
    %2 = arith.cmpi ne, %1, %c0_i32_0 : i32
    scf.if %2 {
      %cst_19 = arith.constant 0.000000e+00 : f32
      %50 = vector.broadcast %cst_19 : f32 to vector<8x128xf32>
      %c0_20 = arith.constant 0 : index
      %c0_21 = arith.constant 0 : index
      %51 = vector.load %arg5[%c0_20, %c0_21] : memref<8x128xf32, #tpu.memory_space<vmem>>, vector<8x128xf32>
      tpu.vector_store %arg5[%c0_20, %c0_21], %50 {strides = array<i32>} : memref<8x128xf32, #tpu.memory_space<vmem>>, vector<8x128xf32>,
    } else {
    }
    %c0 = arith.constant 0 : index
    %c0_1 = arith.constant 0 : index
    %c0_2 = arith.constant 0 : index
    %3 = vector.load %arg2[%c0, %c0_1, %c0_2] : memref<3x8x128xf32, #tpu.memory_space<vmem>>, vector<1x8x128xf32>
    %4 = vector.shape_cast %3 : vector<1x8x128xf32> to vector<8x128xf32>
    %c1 = arith.constant 1 : index
    %c0_3 = arith.constant 0 : index
    %c0_4 = arith.constant 0 : index
    %5 = vector.load %arg2[%c1, %c0_3, %c0_4] : memref<3x8x128xf32, #tpu.memory_space<vmem>>, vector<1x8x128xf32>
    %6 = vector.shape_cast %5 : vector<1x8x128xf32> to vector<8x128xf32>
    %c2 = arith.constant 2 : index
    %c0_5 = arith.constant 0 : index
    %c0_6 = arith.constant 0 : index
    %7 = vector.load %arg2[%c2, %c0_5, %c0_6] : memref<3x8x128xf32, #tpu.memory_space<vmem>>, vector<1x8x128xf32>
    %8 = vector.shape_cast %7 : vector<1x8x128xf32> to vector<8x128xf32>
    %c0_7 = arith.constant 0 : index
    %c0_8 = arith.constant 0 : index
    %9 = vector.load %arg3[%c0_7, %c0_8] : memref<8x128xi32, #tpu.memory_space<vmem>>, vector<8x128xi32>
    %10 = arith.maximumf %4, %6 : vector<8x128xf32>
    %11 = arith.minimumf %4, %6 : vector<8x128xf32>
    %12 = arith.maximumf %10, %8 : vector<8x128xf32>
    %13 = arith.minimumf %10, %8 : vector<8x128xf32>
    %14 = arith.subf %11, %12 : vector<8x128xf32>
    %15 = math.exp %14 : vector<8x128xf32>
    %16 = arith.subf %13, %12 : vector<8x128xf32>
    %17 = math.exp %16 : vector<8x128xf32>
    %18 = arith.addf %15, %17 : vector<8x128xf32>
    %cst = arith.constant 1.000000e+00 : f32
    %19 = vector.broadcast %cst : f32 to vector<8x128xf32>
    %20 = arith.addf %19, %18 : vector<8x128xf32>
    %21 = math.log %20 : vector<8x128xf32>
    %22 = arith.addf %12, %21 : vector<8x128xf32>
    %c0_i32_9 = arith.constant 0 : i32
    %23 = vector.broadcast %c0_i32_9 : i32 to vector<8x128xi32>
    %24 = arith.cmpi eq, %9, %23 : vector<8x128xi32>
    %c1_i32 = arith.constant 1 : i32
    %25 = vector.broadcast %c1_i32 : i32 to vector<8x128xi32>
    %26 = arith.cmpi eq, %9, %25 : vector<8x128xi32>
    %27 = arith.select %26, %6, %8 : vector<8x128xi1>, vector<8x128xf32>
    %28 = arith.select %24, %4, %27 : vector<8x128xi1>, vector<8x128xf32>
    %29 = arith.subf %22, %28 : vector<8x128xf32>
    %30 = tpu.iota {dimensions = array<i32: 0>} : vector<8x128xi32>
    %31 = tpu.iota {dimensions = array<i32: 1>} : vector<8x128xi32>
    %c1_i32_10 = arith.constant 1 : i32
    %32 = arith.muli %arg0, %c1_i32_10 : i32
    %33 = arith.addi %32, %arg1 : i32
    %c8_i32 = arith.constant 8 : i32
    %34 = arith.muli %33, %c8_i32 : i32
    %35 = vector.broadcast %34 : i32 to vector<8x128xi32>
    %36 = arith.addi %35, %30 : vector<8x128xi32>
    %c128_i32 = arith.constant 128 : i32
    %37 = vector.broadcast %c128_i32 : i32 to vector<8x128xi32>
    %38 = arith.muli %36, %37 : vector<8x128xi32>
    %39 = arith.addi %38, %31 : vector<8x128xi32>
    %c0_11 = arith.constant 0 : index
    %c0_12 = arith.constant 0 : index
    %40 = vector.load %arg5[%c0_11, %c0_12] : memref<8x128xf32, #tpu.memory_space<vmem>>, vector<8x128xf32>
    %c8_i32_13 = arith.constant 8 : i32
    %41 = vector.broadcast %c8_i32_13 : i32 to vector<8x128xi32>
    %42 = arith.cmpi slt, %39, %41 : vector<8x128xi32>
    %cst_14 = arith.constant 0.000000e+00 : f32
    %43 = vector.broadcast %cst_14 : f32 to vector<8x128xf32>
    %44 = arith.select %42, %29, %43 : vector<8x128xi1>, vector<8x128xf32>
    %45 = arith.addf %40, %44 : vector<8x128xf32>
    %c0_15 = arith.constant 0 : index
    %c0_16 = arith.constant 0 : index
    %46 = vector.load %arg5[%c0_15, %c0_16] : memref<8x128xf32, #tpu.memory_space<vmem>>, vector<8x128xf32>
    tpu.vector_store %arg5[%c0_15, %c0_16], %45 {strides = array<i32>} : memref<8x128xf32, #tpu.memory_space<vmem>>, vector<8x128xf32>,
    %c0_i32_17 = arith.constant 0 : i32
    %47 = arith.cmpi eq, %arg1, %c0_i32_17 : i32
    %48 = arith.extui %47 : i1 to i32
    %c0_i32_18 = arith.constant 0 : i32
    %49 = arith.cmpi ne, %48, %c0_i32_18 : i32
    scf.if %49 {
      %c0_19 = arith.constant 0 : index
      %c0_20 = arith.constant 0 : index
      %50 = vector.load %arg5[%c0_19, %c0_20] : memref<8x128xf32, #tpu.memory_space<vmem>>, vector<8x128xf32>
      %51 = vector.shape_cast %50 : vector<8x128xf32> to vector<1x8x128xf32>
      %cst_21 = arith.constant dense<0.000000e+00> : vector<1xf32>
      %52 = vector.multi_reduction <add>, %51, %cst_21 [1, 2] : vector<1x8x128xf32> to vector<1xf32>
      %53 = vector.shape_cast %52 : vector<1xf32> to vector<1x1x1xf32>
      %54 = vector.extract %53[0, 0, 0] : f32 from vector<1x1x1xf32>
      %55 = vector.broadcast %54 : f32 to vector<1x1x1xf32>
      %c0_22 = arith.constant 0 : index
      %c0_23 = arith.constant 0 : index
      %c0_24 = arith.constant 0 : index
      %56 = vector.load %arg4[%c0_22, %c0_23, %c0_24] : memref<1x1x1xf32, #tpu.memory_space<vmem>>, vector<1x1x1xf32>
      tpu.vector_store %arg4[%c0_22, %c0_23, %c0_24], %55 {strides = array<i32>} : memref<1x1x1xf32, #tpu.memory_space<vmem>>, vector<1x1x1xf32>,
    } else {
    }
    return
  }
  func.func @transform_0(%arg0: i32, %arg1: i32) -> (i32, i32, i32) {
    %c1_i32 = arith.constant 1 : i32
    %0 = arith.muli %arg0, %c1_i32 : i32
    %1 = arith.addi %0, %arg1 : i32
    %c0_i32 = arith.constant 0 : i32
    %c0_i32_0 = arith.constant 0 : i32
    %c0_i32_1 = arith.constant 0 : i32
    return %c0_i32, %1, %c0_i32_0 : i32, i32, i32
  }
  func.func @transform_1(%arg0: i32, %arg1: i32) -> (i32, i32) {
    %c1_i32 = arith.constant 1 : i32
    %0 = arith.muli %arg0, %c1_i32 : i32
    %1 = arith.addi %0, %arg1 : i32
    %c0_i32 = arith.constant 0 : i32
    %c0_i32_0 = arith.constant 0 : i32
    return %1, %c0_i32 : i32, i32
  }
  func.func @transform_2(%arg0: i32, %arg1: i32) -> (i32, i32, i32) {
    %c0_i32 = arith.constant 0 : i32
    %c0_i32_0 = arith.constant 0 : i32
    %c0_i32_1 = arith.constant 0 : i32
    return %arg0, %c0_i32, %c0_i32_0 : i32, i32, i32
  }
}

</mosaic_0001>

<bundles_post_ra>
// kernel: tpu_custom_call.1
= control target key start
LH: loop header
LB: loop body
LE: loop exit
PB: predicated region body
PF: predicated region fallthrough
CT: control target
= control target key end

     0   :  { %7 = vsyncpa [#allocation4], 0  ;;  %s232_s0 = inlined_call_operand.hbm [shape: f32[3,8,128], index: 0, kind: input, shape index: {}]   ;;  %s233_s1 = inlined_call_operand.hbm [shape: s32[8,128], index: 1, kind: input, shape index: {}]   ;;  %s234_s2 = inlined_call_operand.hbm [shape: f32[1,1,1], index: 2, kind: output, shape index: {}]  }
   0x1   :  { %8 = vsyncpa [#allocation7], 0 }
   0x2   :  { %9 = vsyncpa [#allocation5], 0  ;;  %s203_s9 = smov [#allocation3]  }
   0x3   :  { %s18_s10 = sshll.u32 %s203_s9, 4  ;;  %s19_s10 = int_to_ptr.vmem [resolvable:$true] %s18_s10 }
   0x4   :  { %s145_s11 = scalar_lea.vmem %s19_s10, 384  ;;  %p150_p1 = scmp.lt.s32.totalorder %s19_s10, %s19_s10 }
   0x5   :  { %p146_p0 = scmp.ne.s32.totalorder %s19_s10, %s145_s11  ;;  %p151_p2 = scmp.lt.s32.totalorder %s145_s11, %s145_s11 }
   0x7   :  { %p152_p3 = por %p151_p2, %p150_p1 }
   0x9   :  { %p153_p4 = pnand %p152_p3, %p146_p0 }
   0xb   :  { %156 = shalt.err (!%p153_p4)
}
   0xc   :  { %s204_s12 = smov 128   ;;  %s205_s13 = smov 8  }
   0xd   :  { %24 = dma.hbm_to_vmem [thread:$0]  %s232_s0, 384, %s19_s10, [#allocation4], %s204_s12, %s204_s12, %s205_s13  }
   0xe   :  { %s206_s16 = smov [#allocation6]  }
   0xf   :  { %s34_s17 = sshll.u32 %s206_s16, 4  ;;  %s35_s17 = int_to_ptr.vmem [resolvable:$true] %s34_s17 }
  0x10   :  { %s165_s18 = scalar_lea.vmem %s35_s17, 128  ;;  %p170_p6 = scmp.lt.s32.totalorder %s35_s17, %s35_s17 }
  0x11   :  { %p166_p5 = scmp.ne.s32.totalorder %s35_s17, %s165_s18  ;;  %p171_p7 = scmp.lt.s32.totalorder %s165_s18, %s165_s18 }
  0x13   :  { %p172_p8 = por %p171_p7, %p170_p6 }
  0x15   :  { %p173_p9 = pnand %p172_p8, %p166_p5 }
  0x17   :  { %176 = shalt.err (!%p173_p9)
}
  0x18   :  { %37 = dma.hbm_to_vmem [thread:$0]  %s233_s1, 128, %s35_s17, [#allocation7]  }
  0x19   :  { %197 = dma.done.wait [#allocation4], 384  }
  0x1a   :  { %198 = vsyncadd [#allocation4], 4294966912 }
  0x1b   :  { %199 = dma.done.wait [#allocation7], 128  }
  0x1c   :  { %200 = vsyncadd [#allocation7], 4294967168  ;;  %v51_v0 = vld [vmem:[#allocation3] sm:$0xff]  ;;  %v53_v1 = vld [vmem:[#allocation3 + $0x8] sm:$0xff]  ;;  %v77_v15 = vlaneseq  ;;  %s207_s0 = smov [#allocation8]   ;;  %vm106_vm3 = vcmask 0  }
  0x1d   :  { %v55_v2 = vld [vmem:[#allocation3 + $0x10] sm:$0xff]  ;;  %v57_v3 = vmax.f32 %v51_v0, %v53_v1  ;;  %v58_v4 = vmin.f32 %v51_v0, %v53_v1  ;;  %v56_v17 = vld [vmem:[#allocation6] sm:$0xff]  ;;  %s114_s1 = sshll.u32 %s207_s0, 4  ;;  %s115_s1 = int_to_ptr.vmem [resolvable:$true] %s114_s1 }
  0x1e   :  { %v78_v16 = vshrl.u32 %v77_v15, 7  ;;  %vm73_vm0 = vcmp.eq.s32.totalorder %v56_v17, 1  ;;  %v80_v18 = vand.u32 127, %v77_v15  ;;  %vm72_vm1 = vcmp.eq.s32.totalorder %v56_v17, 0  ;;  %s177_s22 = scalar_lea.vmem %s115_s1, 16  ;;  %s181_s23 = scalar_lea.vmem %s115_s1, 32 }
  0x1f   :  { %v59_v5 = vmax.f32 %v57_v3, %v55_v2  ;;  %v60_v6 = vmin.f32 %v57_v3, %v55_v2  ;;  %v74_v20 = vsel %vm73_vm0, %v53_v1, %v55_v2  ;;  %p178_p10 = scmp.ne.s32.totalorder %s115_s1, %s177_s22  ;;  %p182_p11 = scmp.lt.s32.totalorder %s115_s1, %s115_s1 }
  0x20   :  { %v85_v19 = vmul.u32 128, %v78_v16  ;;  %v75_v24 = vsel %vm72_vm1, %v51_v0, %v74_v20  ;;  %p183_p12 = scmp.lt.s32.totalorder %s181_s23, %s177_s22 }
  0x21   :  { %v61_v7 = vsub.f32 %v58_v4, %v59_v5  ;;  %v64_v8 = vsub.f32 %v60_v6, %v59_v5 }
  0x22   :  { %v86_v22 = vadd.s32 %v85_v19, %v80_v18  ;;  %p184_p13 = por %p183_p12, %p182_p11 }
  0x23   :  { %v62_v9 = vmul.f32 1.442695, %v61_v7  ;;  %v65_v10 = vmul.f32 1.442695, %v64_v8 }
  0x24   :  { %vm88_vm2 = vcmp.lt.s32.totalorder %v86_v22, 8  ;;  %p185_p0 = pnand %p184_p13, %p178_p10 }
  0x25   :  { %131 = vpow2.f32 %v62_v9 }
  0x26   :  { %133 = vpow2.f32 %v65_v10 }
  0x32   :  { %v132_v11 = vpop.eup %131 }
  0x33   :  { %v134_v12 = vpop.eup %133 }
  0x34   :  { %v67_v13 = vadd.f32 %v134_v12, %v132_v11 }
  0x36   :  { %v68_v14 = vadd.f32 1.0, %v67_v13 }
  0x38   :  { %135 = vlog2.f32 %v68_v14 }
  0x45   :  { %v136_v21 = vpop.eup %135 }
  0x46   :  { %v70_v23 = vmul.f32 0.6931472, %v136_v21 }
  0x48   :  { %v71_v25 = vadd.f32 %v70_v23, %v59_v5 }
  0x4a   :  { %v76_v26 = vsub.f32 %v71_v25, %v75_v24 }
  0x4c   :  { %v89_v27 = vsel %vm88_vm2, %v76_v26, 0.0 }
  0x4d   :  { %96 = vadd.xlane.f32.xlu0 %v89_v27 }
  0xd6   :  { %v97_v28 = vpop.xlane.xlu0 %96 }
  0xd7   :  { %v98_v29 = vrot.slane %v97_v28, 4 }
  0xd9   :  { %v99_v30 = vadd.f32 %v98_v29, %v97_v28 }
  0xdb   :  { %v100_v31 = vrot.slane %v99_v30, 2 }
  0xdd   :  { %v101_v32 = vadd.f32 %v100_v31, %v99_v30 }
  0xdf   :  { %v102_v33 = vrot.slane %v101_v32, 1 }
  0xe1   :  { %v103_v34 = vadd.f32 %v102_v33, %v101_v32 }
  0xe3   :  { %124 = vpush %v103_v34 }
 0x114   :  { %s125_s21 = spop %124 }
 0x115   :  { %v105_v35 = vstv %s125_s21 }
 0x116   :  { %107 = vst.msk [vmem:[#allocation8] sm:$0x1] %vm106_vm3, %v105_v35 }
 0x117   :  { %188 = shalt.err (!%p185_p0)
}
 0x118   :  { %117 = dma.vmem_to_hbm [thread:$0]  %s115_s1, 16, %s234_s2, [#allocation5]  }
 0x119   :  { %201 = dma.done.wait [#allocation5], 16  }
 0x11a   :  { %202 = vsyncadd [#allocation5], 4294967280 }
 0x11b   :  { %121 = vsyncpa [#allocation4], 1 }
 0x11c   :  { %122 = vsyncpa [#allocation7], 1 }
 0x11d   :  { %123 = vsyncpa [#allocation5], 1 }

</bundles_post_ra>
